<compile_context>
chip_gen: v5e
topology: v5e:2x2
jax: 0.10.0
libtpu: 0.0.40
codegen_flags: <defaults>
</compile_context>

<pallas_src>
import functools

import jax
import jax.numpy as jnp
from jax.experimental import pallas as pl
from jax.experimental.pallas import tpu as pltpu

BN_EPS = 1e-5


def _linear_bn_kernel(x_ref, w_ref, gb_ref, out_ref, *, relu):
    """One Cout tile of Linear -> BatchNorm1d(train) -> (ReLU).

    x_ref  : (N, Cin) bf16 — full batch, full contraction dim (VMEM-resident).
    w_ref  : (Cin, tn) bf16 weight tile.
    gb_ref : (2, tn)  f32  packed [gamma; beta].
    out_ref: (N, tn)  out dtype (bf16 hidden, f32 final).
    """
    # Full-K matmul on the MXU, f32 accumulation. Operands are already bf16.
    y = jnp.dot(x_ref[...], w_ref[...], preferred_element_type=jnp.float32)

    # One-pass biased batch statistics (torch BatchNorm1d training mode).
    n = y.shape[0]
    inv_n = 1.0 / n
    mean = jnp.sum(y, axis=0, keepdims=True) * inv_n          # E[y]
    mean_sq = jnp.sum(y * y, axis=0, keepdims=True) * inv_n   # E[y^2]
    var = mean_sq - mean * mean                               # biased variance

    gb = gb_ref[...]
    gamma = gb[0:1, :]
    beta = gb[1:2, :]
    scale = gamma * jax.lax.rsqrt(var + BN_EPS)   # rsqrt -> EUP slot
    shift = beta - mean * scale
    y = y * scale + shift                         # BN folded into one FMA
    if relu:
        y = jnp.maximum(y, 0.0)
    out_ref[...] = y.astype(out_ref.dtype)


def linear_bn(x, w, gb, *, relu, tn=256, out_dtype=jnp.bfloat16):
    """y = BN(x @ w) [optionally ReLU], BN uses batch statistics.

    x : (N, Cin) bf16       activations (cast once by the caller)
    w : (Cin, Cout) bf16    weights (transposed vs torch nn.Linear.weight)
    gb: (2, Cout) f32       row 0 = gamma, row 1 = beta
    """
    N, Cin = x.shape
    Cin_w, Cout = w.shape
    assert Cin == Cin_w
    assert x.dtype == jnp.bfloat16 and w.dtype == jnp.bfloat16

    tn = min(tn, Cout)
    assert Cout % tn == 0, "Cout must be a multiple of the output tile width"
    grid = (Cout // tn,)  # single, fully parallel Cout axis

    kernel = functools.partial(_linear_bn_kernel, relu=relu)

    return pl.pallas_call(
        kernel,
        out_shape=jax.ShapeDtypeStruct((N, Cout), out_dtype),
        grid_spec=pltpu.PrefetchScalarGridSpec(
            num_scalar_prefetch=0,
            grid=grid,
            in_specs=[
                # x: same block every grid step -> loaded from HBM exactly once.
                pl.BlockSpec((N, Cin), lambda j: (0, 0)),
                pl.BlockSpec((Cin, tn), lambda j: (0, j)),   # weight tile
                pl.BlockSpec((2, tn), lambda j: (0, j)),     # packed gamma/beta
            ],
            out_specs=pl.BlockSpec((N, tn), lambda j: (0, j)),
        ),
        compiler_params=pltpu.CompilerParams(
            dimension_semantics=("parallel",),
            vmem_limit_bytes=48 * 1024 * 1024,  # fits v7x's 64 MiB physical VMEM
        ),
    )(x, w, gb)


def projection_mlp(x, params, num_layers=3, *, tn=256):
    """Forward pass of projection_MLP (num_layers in {3, 2}, as in the module)."""
    x = x.astype(jnp.bfloat16)  # cast once; activations move HBM<->VMEM as bf16
    if num_layers == 3:
        h = linear_bn(x, params["w1"], params["gb1"], relu=True,
                      tn=tn, out_dtype=jnp.bfloat16)
        h = linear_bn(h, params["w2"], params["gb2"], relu=True,
                      tn=tn, out_dtype=jnp.bfloat16)
        h = linear_bn(h, params["w3"], params["gb3"], relu=False,
                      tn=tn, out_dtype=jnp.float32)
    elif num_layers == 2:
        h = linear_bn(x, params["w1"], params["gb1"], relu=True,
                      tn=tn, out_dtype=jnp.bfloat16)
        h = linear_bn(h, params["w3"], params["gb3"], relu=False,
                      tn=tn, out_dtype=jnp.float32)
    else:
        raise Exception("num_layers must be 2 or 3")
    return h


def init_params(key, in_dim, hidden_dim, out_dim):
    """torch-style init. Linear bias omitted: BN mean-subtraction cancels it."""
    ks = jax.random.split(key, 3)

    def lin_w(k, cin, cout):
        bound = 1.0 / jnp.sqrt(cin)
        w = jax.random.uniform(k, (cin, cout), jnp.float32, -bound, bound)
        return w.astype(jnp.bfloat16)  # store weights bf16 (halves DMA bytes)

    def bn_gb(c):
        # BatchNorm1d default init: gamma=1, beta=0; packed as (2, C).
        return jnp.concatenate(
            [jnp.ones((1, c), jnp.float32), jnp.zeros((1, c), jnp.float32)], axis=0)

    return dict(
        w1=lin_w(ks[0], in_dim, hidden_dim), gb1=bn_gb(hidden_dim),
        w2=lin_w(ks[1], hidden_dim, hidden_dim), gb2=bn_gb(hidden_dim),
        w3=lin_w(ks[2], hidden_dim, out_dim), gb3=bn_gb(out_dim),
    )


def reference(x, p, num_layers=3):
    """Pure-JAX reference with the same bf16 operands / f32 accum / bf16
    inter-layer activations and the same one-pass BN statistics."""
    def lbn(h, w, gb, relu, out_dtype):
        y = jnp.dot(h.astype(jnp.bfloat16), w.astype(jnp.bfloat16),
                    preferred_element_type=jnp.float32)
        inv_n = 1.0 / y.shape[0]
        m = jnp.sum(y, axis=0, keepdims=True) * inv_n
        v = jnp.sum(y * y, axis=0, keepdims=True) * inv_n - m * m
        scale = gb[0:1, :] * jax.lax.rsqrt(v + BN_EPS)
        y = y * scale + (gb[1:2, :] - m * scale)
        if relu:
            y = jnp.maximum(y, 0.0)
        return y.astype(out_dtype)

    if num_layers == 3:
        h = lbn(x, p["w1"], p["gb1"], True, jnp.bfloat16)
        h = lbn(h, p["w2"], p["gb2"], True, jnp.bfloat16)
        return lbn(h, p["w3"], p["gb3"], False, jnp.float32)
    elif num_layers == 2:
        h = lbn(x, p["w1"], p["gb1"], True, jnp.bfloat16)
        return lbn(h, p["w3"], p["gb3"], False, jnp.float32)
    raise Exception


if __name__ == "__main__":
    key = jax.random.PRNGKey(0)
    kx, kp = jax.random.split(key)

    # Small but lane/MXU-aligned shapes: N multiple of 8/16, features multiple of 128.
    N, in_dim, hidden_dim, out_dim = 16, 128, 256, 128
    x = jax.random.normal(kx, (N, in_dim), jnp.float32)
    params = init_params(kp, in_dim, hidden_dim, out_dim)

    out = jax.block_until_ready(projection_mlp(x, params, num_layers=3))
    ref = reference(x, params, num_layers=3)
    assert out.shape == (N, out_dim)
    assert out.dtype == jnp.float32
    assert jnp.allclose(out, ref, atol=5e-3, rtol=5e-3), "3-layer mismatch vs reference"

    out2 = jax.block_until_ready(projection_mlp(x, params, num_layers=2))
    ref2 = reference(x, params, num_layers=2)
    assert jnp.allclose(out2, ref2, atol=5e-3, rtol=5e-3), "2-layer mismatch vs reference"

    print("KERNEL_OK")
</pallas_src>

<mosaic_0001>
module attributes {stable_mosaic.version = 11 : i64} {
  func.func @_linear_bn_kernel(%arg0: i32, %arg1: memref<16x128xbf16, #tpu.memory_space<vmem>>, %arg2: memref<128x256xbf16, #tpu.memory_space<vmem>>, %arg3: memref<2x256xf32, #tpu.memory_space<vmem>>, %arg4: memref<16x256xbf16, #tpu.memory_space<vmem>>) attributes {dimension_semantics = [#tpu.dimension_semantics<parallel>], iteration_bounds = array<i64: 1>, scalar_prefetch = 0 : i64, scratch_operands = 0 : i64, tpu.core_type = #tpu.core_type<tc>, window_params = [{pipeline_mode = #tpu.pipeline_mode<synchronous>, transform_indices = @transform_0, window_bounds = array<i64: 16, 128>}, {transform_indices = @transform_1, window_bounds = array<i64: 128, 256>}, {transform_indices = @transform_2, window_bounds = array<i64: 2, 256>}, {transform_indices = @transform_3, window_bounds = array<i64: 16, 256>}]} {
    %c0 = arith.constant 0 : index
    %c0_0 = arith.constant 0 : index
    %0 = vector.load %arg1[%c0, %c0_0] : memref<16x128xbf16, #tpu.memory_space<vmem>>, vector<16x128xbf16>
    %c0_1 = arith.constant 0 : index
    %c0_2 = arith.constant 0 : index
    %1 = vector.load %arg2[%c0_1, %c0_2] : memref<128x256xbf16, #tpu.memory_space<vmem>>, vector<128x256xbf16>
    %cst = arith.constant dense<0.000000e+00> : vector<16x256xf32>
    %2 = tpu.matmul %0, %1, %cst {dimension_numbers = #tpu.dot_dimension_numbers<[1], [0], [0], [1], [0, 0, 1, 1], [], []>} : vector<16x128xbf16>, vector<128x256xbf16>, vector<16x256xf32> -> vector<16x256xf32>
    %cst_3 = arith.constant dense<0.000000e+00> : vector<256xf32>
    %3 = vector.multi_reduction <add>, %2, %cst_3 [0] : vector<16x256xf32> to vector<256xf32>
    %4 = vector.shape_cast %3 : vector<256xf32> to vector<1x256xf32>
    %cst_4 = arith.constant 6.250000e-02 : f32
    %5 = vector.broadcast %cst_4 : f32 to vector<1x256xf32>
    %6 = arith.mulf %4, %5 : vector<1x256xf32>
    %7 = arith.mulf %2, %2 : vector<16x256xf32>
    %cst_5 = arith.constant dense<0.000000e+00> : vector<256xf32>
    %8 = vector.multi_reduction <add>, %7, %cst_5 [0] : vector<16x256xf32> to vector<256xf32>
    %9 = vector.shape_cast %8 : vector<256xf32> to vector<1x256xf32>
    %cst_6 = arith.constant 6.250000e-02 : f32
    %10 = vector.broadcast %cst_6 : f32 to vector<1x256xf32>
    %11 = arith.mulf %9, %10 : vector<1x256xf32>
    %12 = arith.mulf %6, %6 : vector<1x256xf32>
    %13 = arith.subf %11, %12 : vector<1x256xf32>
    %c0_7 = arith.constant 0 : index
    %c0_8 = arith.constant 0 : index
    %14 = vector.load %arg3[%c0_7, %c0_8] : memref<2x256xf32, #tpu.memory_space<vmem>>, vector<2x256xf32>
    %15 = vector.extract_strided_slice %14 {offsets = [0, 0], sizes = [1, 256], strides = [1, 1]} : vector<2x256xf32> to vector<1x256xf32>
    %16 = vector.extract_strided_slice %14 {offsets = [1, 0], sizes = [1, 256], strides = [1, 1]} : vector<2x256xf32> to vector<1x256xf32>
    %cst_9 = arith.constant 9.99999974E-6 : f32
    %17 = vector.broadcast %cst_9 : f32 to vector<1x256xf32>
    %18 = arith.addf %13, %17 : vector<1x256xf32>
    %19 = math.rsqrt %18 : vector<1x256xf32>
    %20 = arith.mulf %15, %19 : vector<1x256xf32>
    %21 = arith.mulf %6, %20 : vector<1x256xf32>
    %22 = arith.subf %16, %21 : vector<1x256xf32>
    %23 = vector.broadcast %20 : vector<1x256xf32> to vector<16x256xf32>
    %24 = arith.mulf %2, %23 : vector<16x256xf32>
    %25 = vector.broadcast %22 : vector<1x256xf32> to vector<16x256xf32>
    %26 = arith.addf %24, %25 : vector<16x256xf32>
    %cst_10 = arith.constant 0.000000e+00 : f32
    %27 = vector.broadcast %cst_10 : f32 to vector<16x256xf32>
    %28 = arith.maximumf %26, %27 : vector<16x256xf32>
    %29 = arith.truncf %28 : vector<16x256xf32> to vector<16x256xbf16>
    %c0_11 = arith.constant 0 : index
    %c0_12 = arith.constant 0 : index
    %30 = vector.load %arg4[%c0_11, %c0_12] : memref<16x256xbf16, #tpu.memory_space<vmem>>, vector<16x256xbf16>
    tpu.vector_store %arg4[%c0_11, %c0_12], %29 {strides = array<i32>} : memref<16x256xbf16, #tpu.memory_space<vmem>>, vector<16x256xbf16>,
    return
  }
  func.func @transform_0(%arg0: i32) -> (i32, i32) {
    %c0_i32 = arith.constant 0 : i32
    %c0_i32_0 = arith.constant 0 : i32
    %c0_i32_1 = arith.constant 0 : i32
    return %c0_i32, %c0_i32_0 : i32, i32
  }
  func.func @transform_1(%arg0: i32) -> (i32, i32) {
    %c0_i32 = arith.constant 0 : i32
    %c0_i32_0 = arith.constant 0 : i32
    return %c0_i32, %arg0 : i32, i32
  }
  func.func @transform_2(%arg0: i32) -> (i32, i32) {
    %c0_i32 = arith.constant 0 : i32
    %c0_i32_0 = arith.constant 0 : i32
    return %c0_i32, %arg0 : i32, i32
  }
  func.func @transform_3(%arg0: i32) -> (i32, i32) {
    %c0_i32 = arith.constant 0 : i32
    %c0_i32_0 = arith.constant 0 : i32
    return %c0_i32, %arg0 : i32, i32
  }
}

</mosaic_0001>

<bundles_post_ra>
// kernel: tpu_custom_call.1
= control target key start
LH: loop header
LB: loop body
LE: loop exit
PB: predicated region body
PF: predicated region fallthrough
CT: control target
= control target key end

     0   :  { %8 = vsyncpa [#allocation3], 0  ;;  %s590_s0 = inlined_call_operand.hbm [shape: bf16[16,128], index: 0, kind: input, shape index: {}]   ;;  %s591_s1 = inlined_call_operand.hbm [shape: bf16[128,256], index: 1, kind: input, shape index: {}]   ;;  %s592_s2 = inlined_call_operand.hbm [shape: f32[2,256], index: 2, kind: input, shape index: {}]   ;;  %s593_s3 = inlined_call_operand.hbm [shape: bf16[16,256], index: 3, kind: output, shape index: {}]  }
   0x1   :  { %9 = vsyncpa [#allocation6], 0  ;;  %s28_s14 = sshll.u32 %s591_s1, 4  ;;  %s29_s14 = int_to_ptr.hbm [resolvable:$true] %s28_s14 }
   0x2   :  { %10 = vsyncpa [#allocation4], 0  ;;  %s520_s15 = smov [#allocation5]   ;;  %s15_s19 = sshll.u32 %s590_s0, 4  ;;  %s16_s19 = int_to_ptr.hbm [resolvable:$true] %s15_s19 }
   0x3   :  { %s30_s16 = sshll.u32 %s520_s15, 4  ;;  %s521_s20 = smov 128   ;;  %s31_s16 = int_to_ptr.vmem [resolvable:$true] %s30_s16 }
   0x4   :  { %s522_s21 = smov 8   ;;  %s523_s22 = smov [#allocation2]  }
   0x5   :  { %36 = dma.hbm_to_vmem [thread:$0]  %s29_s14, 2048, %s31_s16, [#allocation6], %s521_s20, %s521_s20, %s522_s21  }
   0x6   :  { %s17_s23 = sshll.u32 %s523_s22, 4  ;;  %s524_s1 = smov 64   ;;  %s18_s23 = int_to_ptr.vmem [resolvable:$true] %s17_s23 }
   0x7   :  { %s525_s24 = smov 4   ;;  %s42_s27 = sshll.u32 %s592_s2, 4  ;;  %s43_s27 = int_to_ptr.hbm [resolvable:$true] %s42_s27 }
   0x8   :  { %23 = dma.hbm_to_vmem [thread:$0]  %s16_s19, 128, %s18_s23, [#allocation3], %s524_s1, %s524_s1, %s525_s24  }
   0x9   :  { %s526_s28 = smov [#allocation7]  }
   0xa   :  { %s44_s0 = sshll.u32 %s526_s28, 4  ;;  %s45_s0 = int_to_ptr.vmem [resolvable:$true] %s44_s0 }
   0xb   :  { %47 = dma.hbm_to_vmem [thread:$0]  %s43_s27, 64, %s45_s0, [#allocation6]  }
   0xc   :  { %514 = dma.done.wait [#allocation3], 128  }
   0xd   :  { %515 = vsyncadd [#allocation3], 4294967168 }
   0xe   :  { %516 = dma.done.wait [#allocation6], 2112  }
   0xf   :  { %517 = vsyncadd [#allocation6], 4294965184  ;;  %v383_v0 = vld [vmem:[#allocation5 + $0x70] sm:$0xf]  ;;  %v405_v1 = vld [vmem:[#allocation5 + $0x74] sm:$0xf0] }
  0x10   :  { %v404_v2 = vld [vmem:[#allocation5 + $0x74] sm:$0xf]  ;;  %v384_v3 = vor.u32 %v405_v1, %v383_v0  ;;  %v385_v4 = vld [vmem:[#allocation5 + $0x78] sm:$0xf0]  ;;  %v375_v5 = vld [vmem:[#allocation5 + $0x60] sm:$0xf] }
  0x11   :  { %v403_v6 = vld [vmem:[#allocation5 + $0x64] sm:$0xf0]  ;;  %v388_v7 = vor.u32 %v404_v2, %v385_v4  ;;  %v402_v8 = vld [vmem:[#allocation5 + $0x64] sm:$0xf]  ;;  %v377_v9 = vld [vmem:[#allocation5 + $0x68] sm:$0xf0] }
  0x12   :  { %164 = vmatpush.bf16.msra.mxu0 %v384_v3  ;;  %v376_v10 = vor.u32 %v403_v6, %v375_v5  ;;  %v380_v11 = vor.u32 %v402_v8, %v377_v9  ;;  %v367_v12 = vld [vmem:[#allocation5 + $0x50] sm:$0xf]  ;;  %v401_v13 = vld [vmem:[#allocation5 + $0x54] sm:$0xf0]  ;;  %v400_v14 = vld [vmem:[#allocation5 + $0x54] sm:$0xf] }
  0x13   :  { %178 = vmatpush.bf16.msra.mxu1 %v388_v7  ;;  %v369_v15 = vld [vmem:[#allocation5 + $0x58] sm:$0xf0]  ;;  %v368_v16 = vor.u32 %v401_v13, %v367_v12  ;;  %v359_v18 = vld [vmem:[#allocation5 + $0x40] sm:$0xf]  ;;  %v399_v19 = vld [vmem:[#allocation5 + $0x44] sm:$0xf0] }
  0x14   :  { %v372_v17 = vor.u32 %v400_v14, %v369_v15  ;;  %v398_v20 = vld [vmem:[#allocation5 + $0x44] sm:$0xf]  ;;  %v361_v21 = vld [vmem:[#allocation5 + $0x48] sm:$0xf0]  ;;  %v360_v22 = vor.u32 %v399_v19, %v359_v18  ;;  %v351_v24 = vld [vmem:[#allocation5 + $0x30] sm:$0xf] }
  0x15   :  { %v364_v23 = vor.u32 %v398_v20, %v361_v21  ;;  %v397_v25 = vld [vmem:[#allocation5 + $0x34] sm:$0xf0]  ;;  %v396_v26 = vld [vmem:[#allocation5 + $0x34] sm:$0xf]  ;;  %v353_v27 = vld [vmem:[#allocation5 + $0x38] sm:$0xf0] }
  0x16   :  { %165 = vmatpush.bf16.msra.mxu0 %v376_v10  ;;  %v352_v28 = vor.u32 %v397_v25, %v351_v24  ;;  %v356_v29 = vor.u32 %v396_v26, %v353_v27  ;;  %v343_v30 = vld [vmem:[#allocation5 + $0x20] sm:$0xf]  ;;  %v395_v31 = vld [vmem:[#allocation5 + $0x24] sm:$0xf0]  ;;  %v394_v32 = vld [vmem:[#allocation5 + $0x24] sm:$0xf] }
  0x17   :  { %179 = vmatpush.bf16.msra.mxu1 %v380_v11  ;;  %v345_v33 = vld [vmem:[#allocation5 + $0x28] sm:$0xf0]  ;;  %v344_v34 = vor.u32 %v395_v31, %v343_v30  ;;  %v335_v36 = vld [vmem:[#allocation5 + $0x10] sm:$0xf]  ;;  %v393_v37 = vld [vmem:[#allocation5 + $0x14] sm:$0xf0] }
  0x18   :  { %v348_v35 = vor.u32 %v394_v32, %v345_v33  ;;  %v392_v38 = vld [vmem:[#allocation5 + $0x14] sm:$0xf]  ;;  %v337_v39 = vld [vmem:[#allocation5 + $0x18] sm:$0xf0]  ;;  %v336_v40 = vor.u32 %v393_v37, %v335_v36  ;;  %v327_v42 = vld [vmem:[#allocation5] sm:$0xf] }
  0x19   :  { %v340_v41 = vor.u32 %v392_v38, %v337_v39  ;;  %v391_v43 = vld [vmem:[#allocation5 + $0x4] sm:$0xf0]  ;;  %v390_v44 = vld [vmem:[#allocation5 + $0x4] sm:$0xf]  ;;  %v329_v45 = vld [vmem:[#allocation5 + $0x8] sm:$0xf0] }
  0x1a   :  { %166 = vmatpush.bf16.msra.mxu0 %v368_v16  ;;  %v328_v46 = vor.u32 %v391_v43, %v327_v42  ;;  %v332_v47 = vor.u32 %v390_v44, %v329_v45  ;;  %v389_v48 = vld [vmem:[#allocation2] sm:$0xff]  ;;  %vm258_vm5 = vcmask 1041408   ;;  %v232_v44 = vld [vmem:[#allocation7] sm:$0xf]  ;;  %s527_s2 = smov [#allocation8]   ;;  %s307_s5 = sshll.u32 %s593_s3, 4  ;;  %s308_s5 = int_to_ptr.hbm [resolvable:$true] %s307_s5 }
  0x1b   :  { %180 = vmatpush.bf16.msra.mxu1 %v372_v17  ;;  %s305_s29 = sshll.u32 %s527_s2, 4  ;;  %s306_s29 = int_to_ptr.vmem [resolvable:$true] %s305_s29 }
  0x1e   :  { %167 = vmatpush.bf16.msra.mxu0 %v360_v22 }
  0x1f   :  { %181 = vmatpush.bf16.msra.mxu1 %v364_v23 }
  0x22   :  { %168 = vmatpush.bf16.msra.mxu0 %v352_v28 }
  0x23   :  { %182 = vmatpush.bf16.msra.mxu1 %v356_v29 }
  0x26   :  { %169 = vmatpush.bf16.msra.mxu0 %v344_v34 }
  0x27   :  { %183 = vmatpush.bf16.msra.mxu1 %v348_v35 }
  0x2a   :  { %170 = vmatpush.bf16.msra.mxu0 %v336_v40 }
  0x2b   :  { %184 = vmatpush.bf16.msra.mxu1 %v340_v41 }
  0x2e   :  { %171 = vmatpush.bf16.msra.mxu0 %v328_v46 }
  0x2f   :  { %185 = vmatpush.bf16.msra.mxu1 %v332_v47 }
  0x31   :  { %172 = vmatmul.bf16.vlgmr.msra.gmra.mxu0 %v389_v48 }
  0x32   :  { %186 = vmatmul.bf16.vlgmr.msra.gmra.mxu1 %v389_v48 }
  0xae   :  { %v560_v49 = vpop.f32.mrf.mxu0 }
  0xaf   :  { %v562_v50 = vpop.f32.mrf.mxu1  ;;  %v208_v52 = vmul.f32 %v560_v49, %v560_v49 }
  0xb0   :  { %v209_v56 = vmul.f32 %v562_v50, %v562_v50 }
  0xb6   :  { %v564_v51 = vpop.f32.mrf.mxu0 }
  0xb7   :  { %v192_v53 = vadd.f32 %v564_v51, %v560_v49  ;;  %v210_v54 = vmul.f32 %v564_v51, %v564_v51  ;;  %v572_v55 = vpop.f32.mrf.mxu1 }
  0xb8   :  { %v199_v57 = vadd.f32 %v572_v55, %v562_v50  ;;  %v211_v58 = vmul.f32 %v572_v55, %v572_v55 }
  0xb9   :  { %v193_v59 = vrot.slane %v192_v53, 4  ;;  %v212_v60 = vadd.f32 %v210_v54, %v208_v52 }
  0xba   :  { %v200_v61 = vrot.slane %v199_v57, 4  ;;  %v219_v62 = vadd.f32 %v211_v58, %v209_v56 }
  0xbb   :  { %v194_v63 = vadd.f32 %v193_v59, %v192_v53  ;;  %v213_v0 = vrot.slane %v212_v60, 4 }
  0xbc   :  { %v201_v1 = vadd.f32 %v200_v61, %v199_v57  ;;  %v220_v2 = vrot.slane %v219_v62, 4 }
  0xbd   :  { %v195_v3 = vrot.slane %v194_v63, 2  ;;  %v214_v4 = vadd.f32 %v213_v0, %v212_v60 }
  0xbe   :  { %v202_v5 = vrot.slane %v201_v1, 2  ;;  %v221_v6 = vadd.f32 %v220_v2, %v219_v62 }
  0xbf   :  { %v196_v7 = vadd.f32 %v195_v3, %v194_v63  ;;  %v215_v8 = vrot.slane %v214_v4, 2 }
  0xc0   :  { %v203_v9 = vadd.f32 %v202_v5, %v201_v1  ;;  %v222_v10 = vrot.slane %v221_v6, 2 }
  0xc1   :  { %v197_v11 = vrot.slane %v196_v7, 1  ;;  %v216_v12 = vadd.f32 %v215_v8, %v214_v4 }
  0xc2   :  { %v204_v13 = vrot.slane %v203_v9, 1  ;;  %v223_v14 = vadd.f32 %v222_v10, %v221_v6 }
  0xc3   :  { %v198_v15 = vadd.f32 %v197_v11, %v196_v7  ;;  %v217_v16 = vrot.slane %v216_v12, 1 }
  0xc4   :  { %v205_v17 = vadd.f32 %v204_v13, %v203_v9  ;;  %v224_v18 = vrot.slane %v223_v14, 1 }
  0xc5   :  { %v206_v19 = vmul.f32 0.0625, %v198_v15  ;;  %v218_v20 = vadd.f32 %v217_v16, %v216_v12 }
  0xc6   :  { %v207_v21 = vmul.f32 0.0625, %v205_v17  ;;  %v225_v22 = vadd.f32 %v224_v18, %v223_v14 }
  0xc7   :  { %v226_v23 = vmul.f32 0.0625, %v218_v20  ;;  %v228_v24 = vmul.f32 %v206_v19, %v206_v19 }
  0xc8   :  { %v227_v25 = vmul.f32 0.0625, %v225_v22  ;;  %v229_v26 = vmul.f32 %v207_v21, %v207_v21 }
  0xc9   :  { %v230_v27 = vsub.f32 %v226_v23, %v228_v24 }
  0xca   :  { %v231_v28 = vsub.f32 %v227_v25, %v229_v26 }
  0xcb   :  { %v233_v29 = vadd.f32 1e-05, %v230_v27 }
  0xcc   :  { %v234_v30 = vadd.f32 1e-05, %v231_v28 }
  0xcd   :  { %414 = vrsqrt.f32 %v233_v29  ;;  %vm241_vm4 = vweird.f32 %v233_v29 }
  0xce   :  { %416 = vrsqrt.f32 %v234_v30  ;;  %vm251_vm2 = vweird.f32 %v234_v30 }
  0xd3   :  { %v415_v31 = vpop.eup %414 }
  0xd4   :  { %v417_v32 = vpop.eup %416  ;;  %v236_v33 = vmul.f32 %v415_v31, %v233_v29  ;;  %vm242_vm1 = vweird.f32 %v415_v31 }
  0xd5   :  { %v246_v34 = vmul.f32 %v417_v32, %v234_v30  ;;  %vm252_vm0 = vweird.f32 %v417_v32  ;;  %vm243_vm6 = vmor %vm241_vm4, %vm242_vm1 }
  0xd6   :  { %v237_v35 = vmul.f32 %v415_v31, %v236_v33  ;;  %vm253_vm3 = vmor %vm251_vm2, %vm252_vm0 }
  0xd7   :  { %v247_v36 = vmul.f32 %v417_v32, %v246_v34 }
  0xd8   :  { %v238_v37 = vmul.f32 0.5, %v237_v35 }
  0xd9   :  { %v248_v38 = vmul.f32 0.5, %v247_v36 }
  0xda   :  { %v239_v39 = vsub.f32 1.5, %v238_v37 }
  0xdb   :  { %v249_v40 = vsub.f32 1.5, %v248_v38 }
  0xdc   :  { %v240_v41 = vmul.f32 %v415_v31, %v239_v39 }
  0xdd   :  { %v250_v42 = vmul.f32 %v417_v32, %v249_v40 }
  0xde   :  { %v244_v46 = vsel %vm243_vm6, %v415_v31, %v240_v41 }
  0xdf   :  { %v254_v43 = vsel %vm253_vm3, %v417_v32, %v250_v42 }
  0xe0   :  { %v257_v45 = vrot.slane %v254_v43, 6 }
  0xe2   :  { %v259_v47 = vsel %vm258_vm5, %v244_v46, %v257_v45 }
  0xe3   :  { %v261_v48 = vmul.f32 %v259_v47, %v232_v44 }
  0xe5   :  { %v263_v52 = vperm.slane %v261_v48, 0  ;;  %v264_v53 = vperm.slane %v261_v48, 2 }
  0xe7   :  { %v268_v54 = vmul.f32 %v264_v53, %v207_v21  ;;  %v267_v56 = vmul.f32 %v263_v52, %v206_v19  ;;  %v276_v60 = vperm.slane %v263_v52, 0  ;;  %v277_v61 = vperm.slane %v264_v53, 0 }
  0xe9   :  { %v271_v57 = vrot.slane %v268_v54, 6  ;;  %v279_v1 = vmul.f32 %v277_v61, %v562_v50  ;;  %v280_v2 = vmul.f32 %v276_v60, %v564_v51  ;;  %v281_v3 = vmul.f32 %v277_v61, %v572_v55 }
  0xea   :  { %v278_v6 = vmul.f32 %v276_v60, %v560_v49 }
  0xeb   :  { %v272_v58 = vsel %vm258_vm5, %v267_v56, %v271_v57 }
  0xec   :  { %v273_v59 = vrot.slane %v272_v58, 7 }
  0xee   :  { %v275_v62 = vsub.f32 %v232_v44, %v273_v59 }
  0xf0   :  { %v283_v63 = vperm.slane %v275_v62, 1  ;;  %v284_v0 = vperm.slane %v275_v62, 3 }
  0xf2   :  { %v287_v4 = vperm.slane %v283_v63, 1  ;;  %v288_v5 = vperm.slane %v284_v0, 1 }
  0xf4   :  { %v290_v7 = vadd.f32 %v288_v5, %v279_v1  ;;  %v291_v8 = vadd.f32 %v287_v4, %v280_v2  ;;  %v292_v9 = vadd.f32 %v288_v5, %v281_v3  ;;  %v289_v10 = vadd.f32 %v287_v4, %v278_v6 }
  0xf6   :  { %v294_v11 = vmax.f32 %v290_v7, 0.0  ;;  %v295_v12 = vmax.f32 %v291_v8, 0.0  ;;  %v296_v13 = vmax.f32 %v292_v9, 0.0  ;;  %v293_v14 = vmax.f32 %v289_v10, 0.0 }
  0xf8   :  { %v298_v50 = vpack.c.bf16 %v296_v13, %v295_v12  ;;  %v297_v51 = vpack.c.bf16 %v294_v11, %v293_v14 }
  0xfa   :  { %300 = vst [vmem:[#allocation8 + $0x8] sm:$0xff] %v298_v50 }
  0xfb   :  { %299 = vst [vmem:[#allocation8] sm:$0xff] %v297_v51 }
  0xfc   :  { %313 = dma.vmem_to_hbm [thread:$0]  %s306_s29, 256, %s308_s5, [#allocation4], %s521_s20, %s521_s20, %s522_s21  }
  0xfd   :  { %518 = dma.done.wait [#allocation4], 256  }
  0xfe   :  { %519 = vsyncadd [#allocation4], 4294967040 }
  0xff   :  { %318 = vsyncpa [#allocation3], 1 }
 0x100   :  { %319 = vsyncpa [#allocation6], 1 }
 0x101   :  { %320 = vsyncpa [#allocation4], 1 }

</bundles_post_ra>
